<compile_context>
chip_gen: v6e
topology: v6e:2x2x1
jax: 0.10.0
libtpu: 0.0.40
codegen_flags: <defaults>
</compile_context>

<pallas_src>
import jax
import jax.numpy as jnp
import numpy as np
from jax.experimental import pallas as pl
from jax.experimental.pallas import tpu as pltpu


_TARGET_BLOCK_BYTES = 4 * 1024 * 1024   # per-input, per-grid-step (native dtype)
_VMEM_LIMIT_BYTES = 48 * 1024 * 1024    # buffers + widened f32 temporaries, all gens
_MIN_SPLIT_BYTES = 1 * 1024 * 1024      # fold path: split k for DMA/compute overlap


def _make_jaccard_kernel(rows, tr, needs_mask):
    """Blocks: x,y -> (nb, tr, 128); outputs are (nb, 128) lane-dense f32 accumulators."""

    def kernel(x_ref, y_ref, inter_ref, total_ref):
        k = pl.program_id(1)

        @pl.when(k == 0)
        def _init():
            inter_ref[...] = jnp.zeros_like(inter_ref)
            total_ref[...] = jnp.zeros_like(total_ref)

        def accumulate(mask_tail):
            x = x_ref[...].astype(jnp.float32)
            y = y_ref[...].astype(jnp.float32)
            if mask_tail:
                # Last row-tile may extend past `rows`; zero the OOB rows
                # (their VMEM contents are unspecified).
                ridx = k * tr + jax.lax.broadcasted_iota(jnp.int32, x.shape, 1)
                valid = ridx < rows
                x = jnp.where(valid, x, 0.0)
                y = jnp.where(valid, y, 0.0)
            # Per-lane partial sums -> (nb, 128).  The cross-lane reduce happens
            # in the JAX epilogue, so the hot loop does sublane reductions only
            # and the store is a dense 128-wide vst.
            inter_ref[...] += jnp.sum(x * y, axis=1)
            total_ref[...] += jnp.sum(x + y, axis=1)

        if needs_mask:
            last = pl.num_programs(1) - 1

            @pl.when(k == last)
            def _tail():
                accumulate(True)

            @pl.when(k != last)
            def _body():
                accumulate(False)
        else:
            accumulate(False)

    return kernel


def jaccard_loss(x, y, smooth=1e-6):
    """1 - mean IoU over the batch, matching the PyTorch jaccardloss.forward."""
    assert x.shape == y.shape
    B = x.shape[0]
    n = int(np.prod(x.shape[1:]))

    xf = x.reshape(B, n)
    yf = y.reshape(B, n)

    # Split off any ragged (< 128 element) lane tail; it is summed in the tiny
    # JAX epilogue instead of materializing a padded copy of the whole input.
    n_main = (n // 128) * 128
    rem = n - n_main
    if rem:
        xt = xf[:, n_main:].astype(jnp.float32)
        yt = yf[:, n_main:].astype(jnp.float32)
        tail_inter = jnp.sum(xt * yt, axis=1)
        tail_total = jnp.sum(xt + yt, axis=1)
    rows = n_main // 128

    if rows == 0:
        # Degenerate tiny shape: everything handled by the epilogue sums.
        inter = tail_inter
        total = tail_total
    else:
        xm = xf[:, :n_main].reshape(B, rows, 128)
        ym = yf[:, :n_main].reshape(B, rows, 128)

        itemsize = max(xm.dtype.itemsize, ym.dtype.itemsize)
        per_sample_bytes = rows * 128 * itemsize
        # ~4 MiB of rows per step: 8192 rows (f32), 16384 rows (bf16/fp16).
        tr_target = max(8, _TARGET_BLOCK_BYTES // (128 * itemsize))

        if per_sample_bytes >= _TARGET_BLOCK_BYTES:
            # Large samples: one sample per batch step, row axis tiled to ~4 MiB.
            nb = 1
            tr = tr_target
            num_k = pl.cdiv(rows, tr)
        else:
            # Small/medium samples: chunk the batch so each step still moves ~4 MiB.
            nb_raw = max(1, _TARGET_BLOCK_BYTES // per_sample_bytes)
            if nb_raw >= B:
                nb = B
            elif nb_raw >= 8:
                nb = (nb_raw // 8) * 8   # sublane-aligned batch chunk
            else:
                nb = int(nb_raw)
            tr = rows
            num_k = 1
            # Whole-batch fold with > 1 MiB of data: split the row axis so the
            # BlockSpec pipeline can overlap DMA with compute.
            if nb == B and B * per_sample_bytes > _MIN_SPLIT_BYTES and rows >= 16:
                tr = ((pl.cdiv(rows, 2) + 7) // 8) * 8
                num_k = pl.cdiv(rows, tr)

        grid_b = pl.cdiv(B, nb)
        needs_mask = (rows % tr) != 0
        kernel = _make_jaccard_kernel(rows, tr, needs_mask)

        flops = 3 * B * n  # one mul + two adds per element (approx.)
        bytes_accessed = (B * n * (xm.dtype.itemsize + ym.dtype.itemsize)
                          + 2 * B * 128 * 4)

        inter_lanes, total_lanes = pl.pallas_call(
            kernel,
            out_shape=(
                jax.ShapeDtypeStruct((B, 128), jnp.float32),
                jax.ShapeDtypeStruct((B, 128), jnp.float32),
            ),
            grid=(grid_b, num_k),
            in_specs=[
                pl.BlockSpec((nb, tr, 128), lambda b, k: (b, k, 0)),
                pl.BlockSpec((nb, tr, 128), lambda b, k: (b, k, 0)),
            ],
            out_specs=(
                pl.BlockSpec((nb, 128), lambda b, k: (b, 0)),
                pl.BlockSpec((nb, 128), lambda b, k: (b, 0)),
            ),
            compiler_params=pltpu.CompilerParams(
                dimension_semantics=("parallel", "arbitrary"),
                vmem_limit_bytes=_VMEM_LIMIT_BYTES,
            ),
            cost_estimate=pl.CostEstimate(
                flops=flops, transcendentals=0, bytes_accessed=bytes_accessed),
        )(xm, ym)

        # Cross-lane reduce (moved out of the hot loop).
        inter = jnp.sum(inter_lanes, axis=1)
        total = jnp.sum(total_lanes, axis=1)
        if rem:
            inter = inter + tail_inter
            total = total + tail_total

    union = total - inter
    iou = (inter + smooth) / (union + smooth)
    return 1.0 - jnp.mean(iou)


def _jaccard_loss_ref(x, y, smooth=1e-6):
    # Pure-JAX reference (mirrors the torch semantics).
    inter = jnp.sum(x * y, axis=(1, 2, 3))
    union = jnp.sum(x + y, axis=(1, 2, 3)) - inter
    iou = (inter + smooth) / (union + smooth)
    return 1.0 - jnp.mean(iou)


if __name__ == "__main__":
    key = jax.random.PRNGKey(0)
    kx, ky = jax.random.split(key)

    B, C, H, W = 2, 4, 16, 16
    # "predictions": probabilities in (0, 1); "masks": binary targets.
    x = jax.nn.sigmoid(jax.random.normal(kx, (B, C, H, W), dtype=jnp.float32))
    y = (jax.random.uniform(ky, (B, C, H, W)) > 0.5).astype(jnp.float32)

    loss = jaccard_loss(x, y)
    loss = jax.block_until_ready(loss)

    ref = jax.block_until_ready(_jaccard_loss_ref(x, y))
    np.testing.assert_allclose(np.asarray(loss), np.asarray(ref), rtol=1e-5, atol=1e-6)

    print("KERNEL_OK")
</pallas_src>

<mosaic_0001>
module attributes {stable_mosaic.version = 11 : i64} {
  func.func @kernel(%arg0: i32, %arg1: i32, %arg2: memref<2x8x128xf32, #tpu.memory_space<vmem>>, %arg3: memref<2x8x128xf32, #tpu.memory_space<vmem>>, %arg4: memref<2x128xf32, #tpu.memory_space<vmem>>, %arg5: memref<2x128xf32, #tpu.memory_space<vmem>>) attributes {dimension_semantics = [#tpu.dimension_semantics<parallel>, #tpu.dimension_semantics<arbitrary>], iteration_bounds = array<i64: 1, 1>, scalar_prefetch = 0 : i64, scratch_operands = 0 : i64, tpu.core_type = #tpu.core_type<tc>, window_params = [{transform_indices = @transform_0, window_bounds = array<i64: 2, 8, 128>}, {transform_indices = @transform_1, window_bounds = array<i64: 2, 8, 128>}, {transform_indices = @transform_2, window_bounds = array<i64: 2, 128>}, {transform_indices = @transform_3, window_bounds = array<i64: 2, 128>}]} {
    %c0_i32 = arith.constant 0 : i32
    %0 = arith.cmpi eq, %arg1, %c0_i32 : i32
    %1 = arith.extui %0 : i1 to i32
    %c0_i32_0 = arith.constant 0 : i32
    %2 = arith.cmpi ne, %1, %c0_i32_0 : i32
    scf.if %2 {
      %cst_15 = arith.constant 0.000000e+00 : f32
      %15 = vector.broadcast %cst_15 : f32 to vector<2x128xf32>
      %c0_16 = arith.constant 0 : index
      %c0_17 = arith.constant 0 : index
      %16 = vector.load %arg4[%c0_16, %c0_17] : memref<2x128xf32, #tpu.memory_space<vmem>>, vector<2x128xf32>
      tpu.vector_store %arg4[%c0_16, %c0_17], %15 {strides = array<i32>} : memref<2x128xf32, #tpu.memory_space<vmem>>, vector<2x128xf32>,
      %cst_18 = arith.constant 0.000000e+00 : f32
      %17 = vector.broadcast %cst_18 : f32 to vector<2x128xf32>
      %c0_19 = arith.constant 0 : index
      %c0_20 = arith.constant 0 : index
      %18 = vector.load %arg5[%c0_19, %c0_20] : memref<2x128xf32, #tpu.memory_space<vmem>>, vector<2x128xf32>
      tpu.vector_store %arg5[%c0_19, %c0_20], %17 {strides = array<i32>} : memref<2x128xf32, #tpu.memory_space<vmem>>, vector<2x128xf32>,
    } else {
    }
    %c0 = arith.constant 0 : index
    %c0_1 = arith.constant 0 : index
    %c0_2 = arith.constant 0 : index
    %3 = vector.load %arg2[%c0, %c0_1, %c0_2] : memref<2x8x128xf32, #tpu.memory_space<vmem>>, vector<2x8x128xf32>
    %c0_3 = arith.constant 0 : index
    %c0_4 = arith.constant 0 : index
    %c0_5 = arith.constant 0 : index
    %4 = vector.load %arg3[%c0_3, %c0_4, %c0_5] : memref<2x8x128xf32, #tpu.memory_space<vmem>>, vector<2x8x128xf32>
    %c0_6 = arith.constant 0 : index
    %c0_7 = arith.constant 0 : index
    %5 = vector.load %arg4[%c0_6, %c0_7] : memref<2x128xf32, #tpu.memory_space<vmem>>, vector<2x128xf32>
    %6 = arith.mulf %3, %4 : vector<2x8x128xf32>
    %cst = arith.constant dense<0.000000e+00> : vector<2x128xf32>
    %7 = vector.multi_reduction <add>, %6, %cst [1] : vector<2x8x128xf32> to vector<2x128xf32>
    %8 = arith.addf %5, %7 : vector<2x128xf32>
    %c0_8 = arith.constant 0 : index
    %c0_9 = arith.constant 0 : index
    %9 = vector.load %arg4[%c0_8, %c0_9] : memref<2x128xf32, #tpu.memory_space<vmem>>, vector<2x128xf32>
    tpu.vector_store %arg4[%c0_8, %c0_9], %8 {strides = array<i32>} : memref<2x128xf32, #tpu.memory_space<vmem>>, vector<2x128xf32>,
    %c0_10 = arith.constant 0 : index
    %c0_11 = arith.constant 0 : index
    %10 = vector.load %arg5[%c0_10, %c0_11] : memref<2x128xf32, #tpu.memory_space<vmem>>, vector<2x128xf32>
    %11 = arith.addf %3, %4 : vector<2x8x128xf32>
    %cst_12 = arith.constant dense<0.000000e+00> : vector<2x128xf32>
    %12 = vector.multi_reduction <add>, %11, %cst_12 [1] : vector<2x8x128xf32> to vector<2x128xf32>
    %13 = arith.addf %10, %12 : vector<2x128xf32>
    %c0_13 = arith.constant 0 : index
    %c0_14 = arith.constant 0 : index
    %14 = vector.load %arg5[%c0_13, %c0_14] : memref<2x128xf32, #tpu.memory_space<vmem>>, vector<2x128xf32>
    tpu.vector_store %arg5[%c0_13, %c0_14], %13 {strides = array<i32>} : memref<2x128xf32, #tpu.memory_space<vmem>>, vector<2x128xf32>,
    return
  }
  func.func @transform_0(%arg0: i32, %arg1: i32) -> (i32, i32, i32) {
    %c0_i32 = arith.constant 0 : i32
    %c0_i32_0 = arith.constant 0 : i32
    return %arg0, %arg1, %c0_i32 : i32, i32, i32
  }
  func.func @transform_1(%arg0: i32, %arg1: i32) -> (i32, i32, i32) {
    %c0_i32 = arith.constant 0 : i32
    %c0_i32_0 = arith.constant 0 : i32
    return %arg0, %arg1, %c0_i32 : i32, i32, i32
  }
  func.func @transform_2(%arg0: i32, %arg1: i32) -> (i32, i32) {
    %c0_i32 = arith.constant 0 : i32
    %c0_i32_0 = arith.constant 0 : i32
    return %arg0, %c0_i32 : i32, i32
  }
  func.func @transform_3(%arg0: i32, %arg1: i32) -> (i32, i32) {
    %c0_i32 = arith.constant 0 : i32
    %c0_i32_0 = arith.constant 0 : i32
    return %arg0, %c0_i32 : i32, i32
  }
}

</mosaic_0001>

<bundles_post_ra>
// kernel: tpu_custom_call.1
= control target key start
LH: loop header
LB: loop body
LE: loop exit
PB: predicated region body
PF: predicated region fallthrough
CT: control target
= control target key end

     0   :  { %9 = vsyncpa [#allocation3], 0  ;;  %s260_s0 = inlined_call_operand.hbm [shape: f32[2,8,128], index: 0, kind: input, shape index: {}]   ;;  %s261_s1 = inlined_call_operand.hbm [shape: f32[2,8,128], index: 1, kind: input, shape index: {}]   ;;  %s262_s2 = inlined_call_operand.hbm [shape: f32[2,128], index: 2, kind: output, shape index: {0}]   ;;  %s263_s3 = inlined_call_operand.hbm [shape: f32[2,128], index: 3, kind: output, shape index: {1}]  }
   0x1   :  { %10 = vsyncpa [#allocation6], 0 }
   0x2   :  { %11 = vsyncpa [#allocation4], 0 }
   0x3   :  { %12 = vsyncpa [#allocation9], 0  ;;  %s221_s12 = smov [#allocation2]  }
   0x4   :  { %s18_s13 = sshll.u32 %s221_s12, 4  ;;  %s19_s13 = int_to_ptr.vmem [resolvable:$true] %s18_s13 }
   0x5   :  { %s141_s14 = scalar_lea.vmem %s19_s13, 256  ;;  %p146_p1 = scmp.lt.s32.totalorder %s19_s13, %s19_s13 }
   0x6   :  { %p142_p0 = scmp.ne.s32.totalorder %s19_s13, %s141_s14  ;;  %p147_p2 = scmp.lt.s32.totalorder %s141_s14, %s141_s14 }
   0x8   :  { %p148_p3 = por %p147_p2, %p146_p1 }
   0xa   :  { %p149_p4 = pnand %p148_p3, %p142_p0 }
   0xc   :  { %152 = shalt.err (!%p149_p4)
}
   0xd   :  { %s222_s15 = smov 128   ;;  %s223_s16 = smov 8  }
   0xe   :  { %24 = dma.hbm_to_vmem [thread:$0]  %s260_s0, 256, %s19_s13, [#allocation3], %s222_s15, %s222_s15, %s223_s16  }
   0xf   :  { %s224_s19 = smov [#allocation5]  }
  0x10   :  { %s30_s20 = sshll.u32 %s224_s19, 4  ;;  %s31_s20 = int_to_ptr.vmem [resolvable:$true] %s30_s20 }
  0x11   :  { %s161_s21 = scalar_lea.vmem %s31_s20, 256  ;;  %p166_p6 = scmp.lt.s32.totalorder %s31_s20, %s31_s20 }
  0x12   :  { %p162_p5 = scmp.ne.s32.totalorder %s31_s20, %s161_s21  ;;  %p167_p7 = scmp.lt.s32.totalorder %s161_s21, %s161_s21 }
  0x14   :  { %p168_p8 = por %p167_p7, %p166_p6 }
  0x16   :  { %p169_p9 = pnand %p168_p8, %p162_p5 }
  0x18   :  { %172 = shalt.err (!%p169_p9)
}
  0x19   :  { %36 = dma.hbm_to_vmem [thread:$0]  %s261_s1, 256, %s31_s20, [#allocation6], %s222_s15, %s222_s15, %s223_s16  }
  0x1a   :  { %213 = dma.done.wait [#allocation3], 256  }
  0x1b   :  { %214 = vsyncadd [#allocation3], 4294967040 }
  0x1c   :  { %215 = dma.done.wait [#allocation6], 256  }
  0x1d   :  { %216 = vsyncadd [#allocation6], 4294967040  ;;  %v225_v0 = vmov 0.0   ;;  %v49_v1 = vld [vmem:[#allocation2] sm:$0xff]  ;;  %v50_v2 = vld [vmem:[#allocation2 + $0x8] sm:$0xff]  ;;  %vm70_vm0 = vcmask 1041409  }
  0x1e   :  { %47 = vst [vmem:[#allocation7] sm:$0x3] %v225_v0  ;;  %48 = vst [vmem:[#allocation8] sm:$0x3] %v225_v0  ;;  %v51_v3 = vld [vmem:[#allocation5] sm:$0xff]  ;;  %v52_v4 = vld [vmem:[#allocation5 + $0x8] sm:$0xff] }
  0x1f   :  { %v54_v5 = vmul.f32 %v51_v3, %v49_v1  ;;  %v76_v6 = vadd.f32 %v51_v3, %v49_v1  ;;  %v55_v7 = vmul.f32 %v52_v4, %v50_v2  ;;  %v77_v8 = vadd.f32 %v52_v4, %v50_v2  ;;  %s226_s0 = smov [#allocation7]   ;;  %s227_s24 = smov [#allocation8]  }
  0x20   :  { %s102_s1 = sshll.u32 %s226_s0, 4  ;;  %s112_s25 = sshll.u32 %s227_s24, 4  ;;  %s103_s1 = int_to_ptr.vmem [resolvable:$true] %s102_s1  ;;  %s113_s25 = int_to_ptr.vmem [resolvable:$true] %s112_s25 }
  0x21   :  { %v56_v9 = vrot.slane %v54_v5, 4  ;;  %v78_v10 = vrot.slane %v76_v6, 4  ;;  %v62_v11 = vrot.slane %v55_v7, 4  ;;  %v84_v12 = vrot.slane %v77_v8, 4  ;;  %s173_s26 = scalar_lea.vmem %s103_s1, 32  ;;  %p178_p11 = scmp.lt.s32.totalorder %s103_s1, %s103_s1 }
  0x22   :  { %p174_p10 = scmp.ne.s32.totalorder %s103_s1, %s173_s26  ;;  %p179_p12 = scmp.lt.s32.totalorder %s173_s26, %s173_s26 }
  0x23   :  { %v57_v13 = vadd.f32 %v56_v9, %v54_v5  ;;  %v79_v14 = vadd.f32 %v78_v10, %v76_v6  ;;  %v63_v15 = vadd.f32 %v62_v11, %v55_v7  ;;  %v85_v16 = vadd.f32 %v84_v12, %v77_v8 }
  0x24   :  { %p180_p13 = por %p179_p12, %p178_p11 }
  0x25   :  { %v58_v17 = vrot.slane %v57_v13, 2  ;;  %v80_v18 = vrot.slane %v79_v14, 2  ;;  %v64_v19 = vrot.slane %v63_v15, 2  ;;  %v86_v20 = vrot.slane %v85_v16, 2  ;;  %v53_v31 = vld [vmem:[#allocation7] sm:$0x3] }
  0x26   :  { %v75_v33 = vld [vmem:[#allocation8] sm:$0x3]  ;;  %p181_p0 = pnand %p180_p13, %p174_p10 }
  0x27   :  { %v59_v21 = vadd.f32 %v58_v17, %v57_v13  ;;  %v81_v22 = vadd.f32 %v80_v18, %v79_v14  ;;  %v65_v23 = vadd.f32 %v64_v19, %v63_v15  ;;  %v87_v24 = vadd.f32 %v86_v20, %v85_v16 }
  0x29   :  { %v60_v25 = vrot.slane %v59_v21, 1  ;;  %v82_v26 = vrot.slane %v81_v22, 1  ;;  %v66_v27 = vrot.slane %v65_v23, 1  ;;  %v88_v28 = vrot.slane %v87_v24, 1 }
  0x2b   :  { %v61_v29 = vadd.f32 %v60_v25, %v59_v21  ;;  %v83_v30 = vadd.f32 %v82_v26, %v81_v22  ;;  %v67_v32 = vadd.f32 %v66_v27, %v65_v23  ;;  %v89_v34 = vadd.f32 %v88_v28, %v87_v24 }
  0x2d   :  { %v71_v35 = vsel %vm70_vm0, %v67_v32, %v61_v29  ;;  %v92_v36 = vsel %vm70_vm0, %v89_v34, %v83_v30 }
  0x2e   :  { %v73_v37 = vadd.f32 %v71_v35, %v53_v31  ;;  %v94_v38 = vadd.f32 %v92_v36, %v75_v33 }
  0x30   :  { %74 = vst [vmem:[#allocation7] sm:$0x3] %v73_v37  ;;  %95 = vst [vmem:[#allocation8] sm:$0x3] %v94_v38 }
  0x31   :  { %184 = shalt.err (!%p181_p0)
}
  0x32   :  { %105 = dma.vmem_to_hbm [thread:$0]  %s103_s1, 32, %s262_s2, [#allocation4]  }
  0x33   :  { %s193_s29 = scalar_lea.vmem %s113_s25, 32  ;;  %p198_p2 = scmp.lt.s32.totalorder %s113_s25, %s113_s25 }
  0x34   :  { %p194_p1 = scmp.ne.s32.totalorder %s113_s25, %s193_s29  ;;  %p199_p3 = scmp.lt.s32.totalorder %s193_s29, %s193_s29 }
  0x36   :  { %p200_p4 = por %p199_p3, %p198_p2 }
  0x38   :  { %p201_p5 = pnand %p200_p4, %p194_p1 }
  0x3a   :  { %204 = shalt.err (!%p201_p5)
}
  0x3b   :  { %115 = dma.vmem_to_hbm [thread:$0]  %s113_s25, 32, %s263_s3, [#allocation9]  }
  0x3c   :  { %217 = dma.done.wait [#allocation4], 32  }
  0x3d   :  { %218 = vsyncadd [#allocation4], 4294967264 }
  0x3e   :  { %219 = dma.done.wait [#allocation9], 32  }
  0x3f   :  { %220 = vsyncadd [#allocation9], 4294967264 }
  0x40   :  { %122 = vsyncpa [#allocation3], 1 }
  0x41   :  { %123 = vsyncpa [#allocation6], 1 }
  0x42   :  { %124 = vsyncpa [#allocation4], 1 }
  0x43   :  { %125 = vsyncpa [#allocation9], 1 }

</bundles_post_ra>
